<compile_context>
chip_gen: v7x
topology: tpu7x:2x2x1
jax: 0.10.0
libtpu: 0.0.40
codegen_flags: <defaults>
</compile_context>

<pallas_src>
import jax
import jax.numpy as jnp
from jax.experimental import pallas as pl
from jax.experimental.pallas import tpu as pltpu

LANE = 128


def _round_up(v: int, m: int) -> int:
    return -(-v // m) * m


def linear_kernel(x_ref, w_ref, b_ref, o_ref):
    """x_ref: (K, TB) VMEM, w_ref: (K, 1) f32 VMEM, b_ref: (1,) f32 SMEM, o_ref: (1, TB) VMEM."""
    x = x_ref[...].astype(jnp.float32)                  # (K, TB): single load, VPU
    prod = x * w_ref[...]                               # one vmul pass against (K, 1) column
    acc = jnp.sum(prod, axis=0, keepdims=True)          # K-reduction on the XLU -> (1, TB)
    o_ref[...] = (acc + b_ref[0]).astype(o_ref.dtype)   # scalar bias add + lane-dense store


def linear_forward(x, weight, bias, *, tile_b=128 * 1024):
    """nn.Linear forward: x (B, K) @ weight.T + bias, with out_features == 1.

    weight: (N, K) in the PyTorch (out_features, in_features) layout.
    bias:   (N,)
    Returns (B, N), matching nn.Linear semantics.
    """
    B, K = x.shape
    N, K2 = weight.shape
    assert K == K2 and N == 1, "kernel is specialized for nn.Linear(K, 1)"
    dtype = x.dtype

    # Batch on the lane axis -> lane-dense (unmasked) output stores.
    x_t = x.T                                           # (K, B)
    b_pad = _round_up(B, LANE)
    if b_pad != B:                                      # pad only to the next 128 lanes
        x_t = jnp.pad(x_t, ((0, 0), (0, b_pad - B)))

    # Tile choice: as big as possible (amortize the ~0.35 us/step overhead),
    # but capped at half the padded batch so v7x's two TensorCores both work.
    if b_pad > LANE:
        half = _round_up(-(-b_pad // 2), LANE)
        tb = max(LANE, min(tile_b, half))
    else:
        tb = LANE
    num_tiles = pl.cdiv(b_pad, tb)

    w_col = weight.reshape(K, 1).astype(jnp.float32)    # (K, 1) VMEM operand
    b_vec = bias.reshape(N).astype(jnp.float32)         # (1,)   SMEM scalar

    itemsize = jnp.dtype(dtype).itemsize
    cost = pl.CostEstimate(
        flops=2 * K * B,
        transcendentals=0,
        bytes_accessed=(K + 1) * B * itemsize,
    )

    out_t = pl.pallas_call(
        linear_kernel,
        out_shape=jax.ShapeDtypeStruct((1, b_pad), dtype),
        grid=(num_tiles,),
        in_specs=[
            pl.BlockSpec((K, tb), lambda i: (0, i)),              # x tile in VMEM
            pl.BlockSpec((K, 1), lambda i: (0, 0)),               # weight column in VMEM
            pl.BlockSpec(memory_space=pltpu.MemorySpace.SMEM),    # bias scalar
        ],
        out_specs=pl.BlockSpec((1, tb), lambda i: (0, i)),
        compiler_params=pltpu.CompilerParams(
            dimension_semantics=("parallel",),  # shard batch tiles across v7x's 2 TCs
            vmem_limit_bytes=40 << 20,          # ~128 B/lane double-buffered at tb=128K
        ),
        cost_estimate=cost,
    )(x_t, w_col, b_vec)

    # (1, b_pad) -> (B, 1): slice + reshape only (no transpose copy).
    return out_t[0, :B].reshape(B, N)


if __name__ == "__main__":
    key = jax.random.PRNGKey(0)
    kx, kw, kb, kx2 = jax.random.split(key, 4)

    batch, in_features, out_features = 8, 3, 1

    # nn.Linear-style init: uniform(-1/sqrt(fan_in), 1/sqrt(fan_in)),
    # weight kept in the PyTorch (out_features, in_features) layout.
    bound = 1.0 / jnp.sqrt(jnp.float32(in_features))
    weight = jax.random.uniform(kw, (out_features, in_features), jnp.float32, -bound, bound)
    bias = jax.random.uniform(kb, (out_features,), jnp.float32, -bound, bound)
    x = jax.random.normal(kx, (batch, in_features), jnp.float32)

    out = jax.block_until_ready(linear_forward(x, weight, bias))
    ref = x @ weight.T + bias[None, :]
    assert out.shape == (batch, out_features)
    assert jnp.allclose(out, ref, atol=1e-5, rtol=1e-5)

    # Also exercise the multi-tile + boundary-block path (tile does not divide
    # the padded batch, so the last block is partial and masked by Pallas).
    batch2 = 300
    x2 = jax.random.normal(kx2, (batch2, in_features), jnp.float32)
    out2 = jax.block_until_ready(linear_forward(x2, weight, bias, tile_b=256))
    ref2 = x2 @ weight.T + bias[None, :]
    assert out2.shape == (batch2, out_features)
    assert jnp.allclose(out2, ref2, atol=1e-5, rtol=1e-5)

    print("KERNEL_OK")
</pallas_src>

<mosaic_0001>
module attributes {stable_mosaic.version = 11 : i64} {
  func.func @linear_kernel(%arg0: i32, %arg1: memref<3x128xf32, #tpu.memory_space<vmem>>, %arg2: memref<3x1xf32, #tpu.memory_space<vmem>>, %arg3: memref<1xf32, #tpu.memory_space<smem>>, %arg4: memref<1x128xf32, #tpu.memory_space<vmem>>) attributes {dimension_semantics = [#tpu.dimension_semantics<parallel>], iteration_bounds = array<i64: 1>, scalar_prefetch = 0 : i64, scratch_operands = 0 : i64, tpu.core_type = #tpu.core_type<tc>, window_params = [{transform_indices = @transform_0, window_bounds = array<i64: 3, 128>}, {pipeline_mode = #tpu.pipeline_mode<synchronous>, transform_indices = @transform_1, window_bounds = array<i64: 3, 1>}, {transform_indices = @transform_2, window_bounds = array<i64: 1>}, {transform_indices = @transform_3, window_bounds = array<i64: 1, 128>}]} {
    %c0 = arith.constant 0 : index
    %c0_0 = arith.constant 0 : index
    %0 = vector.load %arg1[%c0, %c0_0] : memref<3x128xf32, #tpu.memory_space<vmem>>, vector<3x128xf32>
    %c0_1 = arith.constant 0 : index
    %c0_2 = arith.constant 0 : index
    %1 = vector.load %arg2[%c0_1, %c0_2] : memref<3x1xf32, #tpu.memory_space<vmem>>, vector<3x1xf32>
    %2 = vector.broadcast %1 : vector<3x1xf32> to vector<3x128xf32>
    %3 = arith.mulf %0, %2 : vector<3x128xf32>
    %cst = arith.constant dense<0.000000e+00> : vector<128xf32>
    %4 = vector.multi_reduction <add>, %3, %cst [0] : vector<3x128xf32> to vector<128xf32>
    %5 = vector.shape_cast %4 : vector<128xf32> to vector<1x128xf32>
    %c0_3 = arith.constant 0 : index
    %6 = memref.load %arg3[%c0_3] : memref<1xf32, #tpu.memory_space<smem>>
    %7 = vector.broadcast %6 : f32 to vector<1x128xf32>
    %8 = arith.addf %5, %7 : vector<1x128xf32>
    %c0_4 = arith.constant 0 : index
    %c0_5 = arith.constant 0 : index
    %9 = vector.load %arg4[%c0_4, %c0_5] : memref<1x128xf32, #tpu.memory_space<vmem>>, vector<1x128xf32>
    tpu.vector_store %arg4[%c0_4, %c0_5], %8 {strides = array<i32>} : memref<1x128xf32, #tpu.memory_space<vmem>>, vector<1x128xf32>,
    return
  }
  func.func @transform_0(%arg0: i32) -> (i32, i32) {
    %c0_i32 = arith.constant 0 : i32
    %c0_i32_0 = arith.constant 0 : i32
    return %c0_i32, %arg0 : i32, i32
  }
  func.func @transform_1(%arg0: i32) -> (i32, i32) {
    %c0_i32 = arith.constant 0 : i32
    %c0_i32_0 = arith.constant 0 : i32
    %c0_i32_1 = arith.constant 0 : i32
    return %c0_i32, %c0_i32_0 : i32, i32
  }
  func.func @transform_2(%arg0: i32) -> i32 {
    %c0_i32 = arith.constant 0 : i32
    %c0_i32_0 = arith.constant 0 : i32
    return %c0_i32 : i32
  }
  func.func @transform_3(%arg0: i32) -> (i32, i32) {
    %c0_i32 = arith.constant 0 : i32
    %c0_i32_0 = arith.constant 0 : i32
    return %c0_i32, %arg0 : i32, i32
  }
}

</mosaic_0001>

<bundles_post_ra>
// kernel: tpu_custom_call.1
= control target key start
LH: loop header
LB: loop body
LE: loop exit
PB: predicated region body
PF: predicated region fallthrough
CT: control target
= control target key end

     0   :  { %s120_s0 = inlined_call_operand.vmem [shape: f32[3,128], index: 0, kind: input, shape index: {}]   ;;  %s121_s1 = inlined_call_operand.vmem [shape: f32[3,1], index: 1, kind: input, shape index: {}]   ;;  %s122_s2 = inlined_call_operand.<no memory space> [shape: f32[1], index: 2, kind: input, shape index: {}]   ;;  %s123_s3 = inlined_call_operand.hbm [shape: f32[1,128], index: 3, kind: output, shape index: {}]  }
   0x1   :  { %v17_v0 = vld [vmem:[%s121_s1] sm:$0x7] }
   0x2   :  { %9 = vsyncpa [#allocation4], 0  ;;  %v77_v1 = vmov 0   ;;  %v16_v2 = vld [vmem:[%s120_s0] sm:$0x7]  ;;  %vm24_vm0 = vcmask 1042432   ;;  %v33_v11 = vstv %s122_s2 }
   0x3   :  { %52 = vset.pattern.permute.xlu0 %v77_v1  ;;  %s78_s1 = smov [#allocation3]  }
   0x4   :  { %20 = vperm.xlu0 %52, %v17_v0   ;;  %s42_s18 = sshll.u32 %s78_s1, 4  ;;  %s43_s18 = int_to_ptr.vmem [resolvable:$true] %s42_s18 }
   0x5   :  { %s53_s0 = scalar_lea.vmem %s43_s18, 16  ;;  %s57_s19 = scalar_lea.vmem %s43_s18, 32 }
   0x6   :  { %p54_p0 = scmp.ne.s32.totalorder %s43_s18, %s53_s0  ;;  %p58_p1 = scmp.lt.s32.totalorder %s43_s18, %s43_s18 }
   0x7   :  { %p59_p2 = scmp.lt.s32.totalorder %s57_s19, %s53_s0 }
   0x9   :  { %p60_p3 = por %p59_p2, %p58_p1 }
   0xb   :  { %p61_p4 = pnand %p60_p3, %p54_p0 }
  0x83   :  { %v21_v3 = vpop.permute.xlu0 %20 }
  0x84   :  { %v23_v4 = vmul.f32 %v21_v3, %v16_v2 }
  0x86   :  { %v25_v5 = vsel %vm24_vm0, %v23_v4, 0.0 }
  0x87   :  { %v26_v6 = vrot.slane %v25_v5, 4 }
  0x89   :  { %v27_v7 = vadd.f32 %v26_v6, %v25_v5 }
  0x8b   :  { %v28_v8 = vrot.slane %v27_v7, 2 }
  0x8d   :  { %v29_v9 = vadd.f32 %v28_v8, %v27_v7 }
  0x8f   :  { %v30_v10 = vrot.slane %v29_v9, 1 }
  0x91   :  { %v31_v12 = vadd.f32 %v30_v10, %v29_v9 }
  0x93   :  { %v34_v13 = vadd.f32 %v33_v11, %v31_v12 }
  0x95   :  { %35 = vst [vmem:[#allocation3] sm:$0x1] %v34_v13 }
  0x96   :  { %64 = shalt.err (!%p61_p4)
}
  0x97   :  { %s65_s22 = scalar_lea.hbm %s123_s3, 16 }
  0x98   :  { %p66_p5 = scmp.ne.s32.totalorder %s123_s3, %s65_s22  ;;  %p69_p6 = scmp.lt.u32.totalorder %s65_s22, %s123_s3 }
  0x9a   :  { %p71_p7 = pnand %p69_p6, %p66_p5 }
  0x9c   :  { %74 = shalt.err (!%p71_p7)
}
  0x9d   :  { %45 = dma.vmem_to_hbm [thread:$0]  %s43_s18, 16, %s123_s3, [#allocation4]  }
  0x9e   :  { %75 = dma.done.wait [#allocation4], 16  }
  0x9f   :  { %76 = vsyncadd [#allocation4], 4294967280 }
  0xa0   :  { %49 = vsyncpa [#allocation4], 1 }

</bundles_post_ra>
